<compile_context>
chip_gen: v6e
topology: v6e:2x2x1
jax: 0.10.0
libtpu: 0.0.40
codegen_flags: <defaults>
</compile_context>

<pallas_src>
import jax
import jax.numpy as jnp
import numpy as np
from jax.experimental import pallas as pl
from jax.experimental.pallas import tpu as pltpu


def bahdanau_kernel(enc_ref, dh_ref, wt_ref, ut_ref, v_ref, ctx_ref, attn_ref):
    # enc_ref:  (TB, S, 2E)   dh_ref: (TB, 2D)
    # wt_ref:   (2E, A)       ut_ref: (2D, A)      v_ref: (1, A)
    # ctx_ref:  (TB, 2E)      attn_ref: (TB, S)
    enc = enc_ref[...]
    tb, s, e2 = enc.shape
    a = wt_ref.shape[1]

    # W projection over all TB*S rows.  When S is a sublane multiple the
    # reshape is layout-free and we get one large-M MXU matmul; otherwise fall
    # back to a batched contraction (still on the MXU).
    if s % 8 == 0:
        t1 = jnp.dot(enc.reshape(tb * s, e2), wt_ref[...],
                     preferred_element_type=jnp.float32).reshape(tb, s, a)
    else:
        t1 = jnp.einsum("bse,ea->bsa", enc, wt_ref[...],
                        preferred_element_type=jnp.float32)

    # U projection once per batch element (no seq dependence).
    t2 = jnp.dot(dh_ref[...], ut_ref[...],
                 preferred_element_type=jnp.float32)                   # (TB, A)
    t3 = jnp.tanh(t1 + t2[:, None, :])                                 # (TB, S, A)

    # score = t3 @ v^T with N=1: VPU multiply + lane reduction; MXU stays free.
    score = jnp.sum(t3 * v_ref[...][None, :, :], axis=-1)              # (TB, S)

    # softmax over the sequence (lane) axis; reciprocal rides the EUP.
    m = jnp.max(score, axis=-1, keepdims=True)                         # (TB, 1)
    p = jnp.exp(score - m)                                             # (TB, S)
    denom = jnp.sum(p, axis=-1, keepdims=True)                         # (TB, 1)
    attn = p * pl.reciprocal(denom, approx=True)                       # (TB, S)

    # context: batched (1,S)@(S,2E) contraction on the MXU.
    ctx = jnp.einsum("bqs,bse->bqe", attn[:, None, :], enc,
                     preferred_element_type=jnp.float32)               # (TB, 1, 2E)

    ctx_ref[...] = ctx[:, 0, :].astype(ctx_ref.dtype)
    attn_ref[...] = attn.astype(attn_ref.dtype)                        # lane-dense store


def bahdanau_attention(decoder_hidden, encoder_outputs, Wt, Ut, vt, block_b=None):
    """decoder_hidden: (2, B, D) raw bidirectional decoder state;
    encoder_outputs: (B, S, 2E).
    Returns (context (B, 1, 2E), attention_weights (B, S)) — torch semantics."""
    B, S, E2 = encoder_outputs.shape
    D2 = decoder_hidden.shape[0] * decoder_hidden.shape[2]
    A = Wt.shape[1]

    if block_b is None:
        # Whole batch per grid step while it trivially fits VMEM; tile with a
        # smaller block for large batches.  Double-buffered enc input is
        # 2*block_b*S*E2*4 bytes — keep it well below the 32 MiB scoped default
        # (re-derive on v7x: 64 MiB physical VMEM).
        block_b = B if B <= 512 else 512
    assert B % block_b == 0, "pad the batch to a multiple of block_b"

    # glue: (2, B, D) -> (B, 2D)   (matches torch transpose/reshape)
    dh = jnp.transpose(decoder_hidden, (1, 0, 2)).reshape(B, D2)
    v_row = vt.reshape(1, A)  # v weights as a lane-resident row

    ctx2d, attn = pl.pallas_call(
        bahdanau_kernel,
        out_shape=(
            jax.ShapeDtypeStruct((B, E2), encoder_outputs.dtype),
            jax.ShapeDtypeStruct((B, S), jnp.float32),   # weights stay f32
        ),
        grid=(B // block_b,),
        in_specs=[
            pl.BlockSpec((block_b, S, E2), lambda i: (i, 0, 0)),  # encoder outputs
            pl.BlockSpec((block_b, D2), lambda i: (i, 0)),        # flattened dec hidden
            pl.BlockSpec((E2, A), lambda i: (0, 0)),              # W^T (resident)
            pl.BlockSpec((D2, A), lambda i: (0, 0)),              # U^T (resident)
            pl.BlockSpec((1, A), lambda i: (0, 0)),               # v row (resident)
        ],
        out_specs=(
            pl.BlockSpec((block_b, E2), lambda i: (i, 0)),        # context
            pl.BlockSpec((block_b, S), lambda i: (i, 0)),         # attention (lane-dense)
        ),
        compiler_params=pltpu.CompilerParams(
            dimension_semantics=("parallel",),  # batch axis: both TCs on v7x
        ),
    )(encoder_outputs, dh, Wt, Ut, v_row)

    return ctx2d[:, None, :], attn


def reference(decoder_hidden, encoder_outputs, Wt, Ut, vt):
    B, S, _ = encoder_outputs.shape
    dh = jnp.transpose(decoder_hidden, (1, 0, 2)).reshape(B, -1)
    t1 = encoder_outputs @ Wt
    t2 = (dh @ Ut)[:, None, :]
    t3 = jnp.tanh(t1 + t2)
    score = (t3 @ vt)[..., 0]
    aw = jax.nn.softmax(score, axis=-1)
    ctx = jnp.einsum("bs,bse->be", aw, encoder_outputs)[:, None, :]
    return ctx, aw


if __name__ == "__main__":
    # Module hyperparameters (bidirectional -> feature dims 2*hidden)
    encoder_hidden_size = 16   # encoder feature dim = 32
    decoder_hidden_size = 16   # flattened decoder state dim = 32
    attention_size = 32
    B, S = 2, 8

    key = jax.random.PRNGKey(0)
    k_enc, k_dec, k_w, k_u, k_v = jax.random.split(key, 5)

    encoder_outputs = jax.random.normal(k_enc, (B, S, 2 * encoder_hidden_size), jnp.float32)
    decoder_hidden = jax.random.normal(k_dec, (2, B, decoder_hidden_size), jnp.float32)

    # deterministic synthetic weights; stored transposed (in_features, out_features)
    Wt = 0.1 * jax.random.normal(k_w, (2 * encoder_hidden_size, attention_size), jnp.float32)
    Ut = 0.1 * jax.random.normal(k_u, (2 * decoder_hidden_size, attention_size), jnp.float32)
    vt = 0.1 * jax.random.normal(k_v, (attention_size, 1), jnp.float32)

    ctx, attn = bahdanau_attention(decoder_hidden, encoder_outputs, Wt, Ut, vt)
    ctx, attn = jax.block_until_ready((ctx, attn))

    ctx_ref, attn_ref = reference(decoder_hidden, encoder_outputs, Wt, Ut, vt)
    # tolerance accounts for pl.reciprocal(approx=True) in the softmax denominator
    np.testing.assert_allclose(np.asarray(ctx), np.asarray(ctx_ref), atol=1e-3, rtol=1e-3)
    np.testing.assert_allclose(np.asarray(attn), np.asarray(attn_ref), atol=1e-3, rtol=1e-3)

    print("KERNEL_OK")
</pallas_src>

<mosaic_0001>
module attributes {stable_mosaic.version = 11 : i64} {
  func.func @bahdanau_kernel(%arg0: i32, %arg1: memref<2x8x32xf32, #tpu.memory_space<vmem>>, %arg2: memref<2x32xf32, #tpu.memory_space<vmem>>, %arg3: memref<32x32xf32, #tpu.memory_space<vmem>>, %arg4: memref<32x32xf32, #tpu.memory_space<vmem>>, %arg5: memref<1x32xf32, #tpu.memory_space<vmem>>, %arg6: memref<2x32xf32, #tpu.memory_space<vmem>>, %arg7: memref<2x8xf32, #tpu.memory_space<vmem>>) attributes {dimension_semantics = [#tpu.dimension_semantics<parallel>], iteration_bounds = array<i64: 1>, scalar_prefetch = 0 : i64, scratch_operands = 0 : i64, tpu.core_type = #tpu.core_type<tc>, window_params = [{transform_indices = @transform_0, window_bounds = array<i64: 2, 8, 32>}, {transform_indices = @transform_1, window_bounds = array<i64: 2, 32>}, {pipeline_mode = #tpu.pipeline_mode<synchronous>, transform_indices = @transform_2, window_bounds = array<i64: 32, 32>}, {pipeline_mode = #tpu.pipeline_mode<synchronous>, transform_indices = @transform_3, window_bounds = array<i64: 32, 32>}, {pipeline_mode = #tpu.pipeline_mode<synchronous>, transform_indices = @transform_4, window_bounds = array<i64: 1, 32>}, {transform_indices = @transform_5, window_bounds = array<i64: 2, 32>}, {transform_indices = @transform_6, window_bounds = array<i64: 2, 8>}]} {
    %c0 = arith.constant 0 : index
    %c0_0 = arith.constant 0 : index
    %c0_1 = arith.constant 0 : index
    %0 = vector.load %arg1[%c0, %c0_0, %c0_1] : memref<2x8x32xf32, #tpu.memory_space<vmem>>, vector<2x8x32xf32>
    %1 = vector.shape_cast %0 : vector<2x8x32xf32> to vector<16x32xf32>
    %c0_2 = arith.constant 0 : index
    %c0_3 = arith.constant 0 : index
    %2 = vector.load %arg3[%c0_2, %c0_3] : memref<32x32xf32, #tpu.memory_space<vmem>>, vector<32x32xf32>
    %cst = arith.constant dense<0.000000e+00> : vector<16x32xf32>
    %3 = tpu.matmul %1, %2, %cst {dimension_numbers = #tpu.dot_dimension_numbers<[1], [0], [0], [1], [0, 0, 1, 1], [], []>} : vector<16x32xf32>, vector<32x32xf32>, vector<16x32xf32> -> vector<16x32xf32>
    %4 = vector.shape_cast %3 : vector<16x32xf32> to vector<2x8x32xf32>
    %c0_4 = arith.constant 0 : index
    %c0_5 = arith.constant 0 : index
    %5 = vector.load %arg2[%c0_4, %c0_5] : memref<2x32xf32, #tpu.memory_space<vmem>>, vector<2x32xf32>
    %c0_6 = arith.constant 0 : index
    %c0_7 = arith.constant 0 : index
    %6 = vector.load %arg4[%c0_6, %c0_7] : memref<32x32xf32, #tpu.memory_space<vmem>>, vector<32x32xf32>
    %cst_8 = arith.constant dense<0.000000e+00> : vector<2x32xf32>
    %7 = tpu.matmul %5, %6, %cst_8 {dimension_numbers = #tpu.dot_dimension_numbers<[1], [0], [0], [1], [0, 0, 1, 1], [], []>} : vector<2x32xf32>, vector<32x32xf32>, vector<2x32xf32> -> vector<2x32xf32>
    %8 = vector.shape_cast %7 : vector<2x32xf32> to vector<2x1x32xf32>
    %9 = vector.broadcast %8 : vector<2x1x32xf32> to vector<2x8x32xf32>
    %10 = arith.addf %4, %9 : vector<2x8x32xf32>
    %11 = math.tanh %10 : vector<2x8x32xf32>
    %c0_9 = arith.constant 0 : index
    %c0_10 = arith.constant 0 : index
    %12 = vector.load %arg5[%c0_9, %c0_10] : memref<1x32xf32, #tpu.memory_space<vmem>>, vector<1x32xf32>
    %13 = vector.shape_cast %12 : vector<1x32xf32> to vector<1x1x32xf32>
    %14 = vector.broadcast %13 : vector<1x1x32xf32> to vector<2x8x32xf32>
    %15 = arith.mulf %11, %14 : vector<2x8x32xf32>
    %cst_11 = arith.constant dense<0.000000e+00> : vector<2x8xf32>
    %16 = vector.multi_reduction <add>, %15, %cst_11 [2] : vector<2x8x32xf32> to vector<2x8xf32>
    %cst_12 = arith.constant dense<0xFF800000> : vector<2xf32>
    %17 = vector.multi_reduction <maximumf>, %16, %cst_12 [1] : vector<2x8xf32> to vector<2xf32>
    %18 = vector.shape_cast %17 : vector<2xf32> to vector<2x1xf32>
    %19 = vector.broadcast %18 : vector<2x1xf32> to vector<2x8xf32>
    %20 = arith.subf %16, %19 : vector<2x8xf32>
    %21 = math.exp %20 : vector<2x8xf32>
    %cst_13 = arith.constant dense<0.000000e+00> : vector<2xf32>
    %22 = vector.multi_reduction <add>, %21, %cst_13 [1] : vector<2x8xf32> to vector<2xf32>
    %23 = vector.shape_cast %22 : vector<2xf32> to vector<2x1xf32>
    %24 = tpu.reciprocal %23 {approx = true} : vector<2x1xf32> -> vector<2x1xf32>
    %25 = vector.broadcast %24 : vector<2x1xf32> to vector<2x8xf32>
    %26 = arith.mulf %21, %25 : vector<2x8xf32>
    %27 = vector.shape_cast %26 : vector<2x8xf32> to vector<2x1x8xf32>
    "tpu.trace_start"() <{level = 10 : i32, message = "bqs,bse->bqe"}> : () -> ()
    %cst_14 = arith.constant dense<0.000000e+00> : vector<2x1x32xf32>
    %28 = tpu.matmul %27, %0, %cst_14 {dimension_numbers = #tpu.dot_dimension_numbers<[2], [1], [1], [2], [0, 0, 0, 1, 1, 2], [0], [0]>} : vector<2x1x8xf32>, vector<2x8x32xf32>, vector<2x1x32xf32> -> vector<2x1x32xf32>
    "tpu.trace_stop"() : () -> ()
    %29 = vector.shape_cast %28 : vector<2x1x32xf32> to vector<2x32xf32>
    %c0_15 = arith.constant 0 : index
    %c0_16 = arith.constant 0 : index
    %30 = vector.load %arg6[%c0_15, %c0_16] : memref<2x32xf32, #tpu.memory_space<vmem>>, vector<2x32xf32>
    tpu.vector_store %arg6[%c0_15, %c0_16], %29 {strides = array<i32>} : memref<2x32xf32, #tpu.memory_space<vmem>>, vector<2x32xf32>,
    %c0_17 = arith.constant 0 : index
    %c0_18 = arith.constant 0 : index
    %31 = vector.load %arg7[%c0_17, %c0_18] : memref<2x8xf32, #tpu.memory_space<vmem>>, vector<2x8xf32>
    tpu.vector_store %arg7[%c0_17, %c0_18], %26 {strides = array<i32>} : memref<2x8xf32, #tpu.memory_space<vmem>>, vector<2x8xf32>,
    return
  }
  func.func @transform_0(%arg0: i32) -> (i32, i32, i32) {
    %c0_i32 = arith.constant 0 : i32
    %c0_i32_0 = arith.constant 0 : i32
    %c0_i32_1 = arith.constant 0 : i32
    return %arg0, %c0_i32, %c0_i32_0 : i32, i32, i32
  }
  func.func @transform_1(%arg0: i32) -> (i32, i32) {
    %c0_i32 = arith.constant 0 : i32
    %c0_i32_0 = arith.constant 0 : i32
    return %arg0, %c0_i32 : i32, i32
  }
  func.func @transform_2(%arg0: i32) -> (i32, i32) {
    %c0_i32 = arith.constant 0 : i32
    %c0_i32_0 = arith.constant 0 : i32
    %c0_i32_1 = arith.constant 0 : i32
    return %c0_i32, %c0_i32_0 : i32, i32
  }
  func.func @transform_3(%arg0: i32) -> (i32, i32) {
    %c0_i32 = arith.constant 0 : i32
    %c0_i32_0 = arith.constant 0 : i32
    %c0_i32_1 = arith.constant 0 : i32
    return %c0_i32, %c0_i32_0 : i32, i32
  }
  func.func @transform_4(%arg0: i32) -> (i32, i32) {
    %c0_i32 = arith.constant 0 : i32
    %c0_i32_0 = arith.constant 0 : i32
    %c0_i32_1 = arith.constant 0 : i32
    return %c0_i32, %c0_i32_0 : i32, i32
  }
  func.func @transform_5(%arg0: i32) -> (i32, i32) {
    %c0_i32 = arith.constant 0 : i32
    %c0_i32_0 = arith.constant 0 : i32
    return %arg0, %c0_i32 : i32, i32
  }
  func.func @transform_6(%arg0: i32) -> (i32, i32) {
    %c0_i32 = arith.constant 0 : i32
    %c0_i32_0 = arith.constant 0 : i32
    return %arg0, %c0_i32 : i32, i32
  }
}

</mosaic_0001>

<bundles_post_ra>
// kernel: tpu_custom_call.1
= control target key start
LH: loop header
LB: loop body
LE: loop exit
PB: predicated region body
PF: predicated region fallthrough
CT: control target
= control target key end

     0   :  { %12 = vsyncpa [#allocation3], 0  ;;  %s870_s0 = inlined_call_operand.hbm [shape: f32[2,8,32], index: 0, kind: input, shape index: {}]   ;;  %s871_s1 = inlined_call_operand.hbm [shape: f32[2,32], index: 1, kind: input, shape index: {}]   ;;  %s872_s2 = inlined_call_operand.hbm [shape: f32[32,32], index: 2, kind: input, shape index: {}]   ;;  %s873_s3 = inlined_call_operand.hbm [shape: f32[32,32], index: 3, kind: input, shape index: {}]   ;;  %s874_s4 = inlined_call_operand.vmem [shape: f32[1,32], index: 4, kind: input, shape index: {}]   ;;  %s875_s5 = inlined_call_operand.hbm [shape: f32[2,32], index: 5, kind: output, shape index: {0}]   ;;  %s876_s6 = inlined_call_operand.hbm [shape: f32[2,8], index: 6, kind: output, shape index: {1}]  }
   0x1   :  { %13 = vsyncpa [#allocation6], 0 }
   0x2   :  { %14 = vsyncpa [#allocation9], 0 }
   0x3   :  { %15 = vsyncpa [#allocation4], 0 }
   0x4   :  { %16 = vsyncpa [#allocation12], 0  ;;  %s775_s21 = smov [#allocation5]   ;;  %s776_s23 = smov [#allocation2]  }
   0x5   :  { %s35_s22 = sshll.u32 %s775_s21, 4  ;;  %s22_s24 = sshll.u32 %s776_s23, 4  ;;  %s36_s22 = int_to_ptr.vmem [resolvable:$true] %s35_s22  ;;  %s23_s24 = int_to_ptr.vmem [resolvable:$true] %s22_s24 }
   0x6   :  { %s653_s25 = scalar_lea.vmem %s36_s22, 32  ;;  %p658_p1 = scmp.lt.s32.totalorder %s36_s22, %s36_s22 }
   0x7   :  { %p654_p0 = scmp.ne.s32.totalorder %s36_s22, %s653_s25  ;;  %p659_p2 = scmp.lt.s32.totalorder %s653_s25, %s653_s25 }
   0x9   :  { %p660_p3 = por %p659_p2, %p658_p1 }
   0xb   :  { %p661_p4 = pnand %p660_p3, %p654_p0 }
   0xd   :  { %664 = shalt.err (!%p661_p4)
}
   0xe   :  { %38 = dma.hbm_to_vmem [thread:$0]  %s871_s1, 32, %s36_s22, [#allocation6]  }
   0xf   :  { %s673_s28 = scalar_lea.vmem %s23_s24, 256  ;;  %p678_p6 = scmp.lt.s32.totalorder %s23_s24, %s23_s24 }
  0x10   :  { %p674_p5 = scmp.ne.s32.totalorder %s23_s24, %s673_s28  ;;  %p679_p7 = scmp.lt.s32.totalorder %s673_s28, %s673_s28 }
  0x12   :  { %p680_p8 = por %p679_p7, %p678_p6 }
  0x14   :  { %p681_p9 = pnand %p680_p8, %p674_p5 }
  0x16   :  { %684 = shalt.err (!%p681_p9)
}
  0x17   :  { %s777_s29 = smov 128   ;;  %s778_s30 = smov 8  }
  0x18   :  { %28 = dma.hbm_to_vmem [thread:$0]  %s870_s0, 256, %s23_s24, [#allocation3], %s777_s29, %s777_s29, %s778_s30  }
  0x19   :  { %s779_s9 = smov [#allocation7]   ;;  %s780_s11 = smov [#allocation8]  }
  0x1a   :  { %s44_s10 = sshll.u32 %s779_s9, 4  ;;  %s56_s12 = sshll.u32 %s780_s11, 4  ;;  %s45_s10 = int_to_ptr.vmem [resolvable:$true] %s44_s10  ;;  %s57_s12 = int_to_ptr.vmem [resolvable:$true] %s56_s12 }
  0x1b   :  { %s693_s1 = scalar_lea.vmem %s45_s10, 512  ;;  %p698_p11 = scmp.lt.s32.totalorder %s45_s10, %s45_s10 }
  0x1c   :  { %p694_p10 = scmp.ne.s32.totalorder %s45_s10, %s693_s1  ;;  %p699_p12 = scmp.lt.s32.totalorder %s693_s1, %s693_s1 }
  0x1e   :  { %p700_p13 = por %p699_p12, %p698_p11 }
  0x20   :  { %p701_p0 = pnand %p700_p13, %p694_p10 }
  0x22   :  { %704 = shalt.err (!%p701_p0)
}
  0x23   :  { %50 = dma.hbm_to_vmem [thread:$0]  %s872_s2, 512, %s45_s10, [#allocation6], %s777_s29, %s777_s29, %s778_s30  }
  0x24   :  { %s713_s15 = scalar_lea.vmem %s57_s12, 512  ;;  %p718_p2 = scmp.lt.s32.totalorder %s57_s12, %s57_s12 }
  0x25   :  { %p714_p1 = scmp.ne.s32.totalorder %s57_s12, %s713_s15  ;;  %p719_p3 = scmp.lt.s32.totalorder %s713_s15, %s713_s15 }
  0x27   :  { %p720_p4 = por %p719_p3, %p718_p2 }
  0x29   :  { %p721_p5 = pnand %p720_p4, %p714_p1 }
  0x2b   :  { %724 = shalt.err (!%p721_p5)
}
  0x2c   :  { %62 = dma.hbm_to_vmem [thread:$0]  %s873_s3, 512, %s57_s12, [#allocation9], %s777_s29, %s777_s29, %s778_s30  }
  0x2d   :  { %765 = dma.done.wait [#allocation3], 256  }
  0x2e   :  { %766 = vsyncadd [#allocation3], 4294967040 }
  0x2f   :  { %767 = dma.done.wait [#allocation6], 544  }
  0x30   :  { %768 = vsyncadd [#allocation6], 4294966752 }
  0x31   :  { %769 = dma.done.wait [#allocation9], 512  }
  0x32   :  { %770 = vsyncadd [#allocation9], 4294966784  ;;  %v781_v0 = vmov 0.0   ;;  %vm782_vm0 = vmmov 0   ;;  %v169_v1 = vld [vmem:[#allocation8 + $0x18] sm:$0xff]  ;;  %v168_v3 = vld [vmem:[#allocation8 + $0x10] sm:$0xff]  ;;  %v247_v14 = vlaneseq }
  0x33   :  { %600 = vmatprep.subr.mxu1 %v781_v0  ;;  %608 = vmatprep.mubr.msk.f32.mxu1 %vm782_vm0, %v781_v0  ;;  %v82_v2 = vld [vmem:[#allocation7 + $0x18] sm:$0xff]  ;;  %v81_v4 = vld [vmem:[#allocation7 + $0x10] sm:$0xff]  ;;  %v167_v5 = vld [vmem:[#allocation8 + $0x8] sm:$0xff]  ;;  %vm83_vm1 = vcmask 261120   ;;  %v783_v12 = vmov 1966171168  }
  0x34   :  { %601 = vmatpush3.msra.mxu1 %v169_v1  ;;  %589 = vmatprep.subr.mxu0 %v82_v2  ;;  %v80_v6 = vld [vmem:[#allocation7 + $0x8] sm:$0xff]  ;;  %v166_v7 = vld [vmem:[#allocation8] sm:$0xff]  ;;  %v165_v9 = vld [vmem:[#allocation5] sm:$0x3]  ;;  %v245_v13 = vunpack.c.l.s4 %v783_v12  ;;  %v840_v16 = vshrl.u32 %v247_v14, 7  ;;  %v298_v38 = vand.u32 127, %v247_v14 }
  0x35   :  { %602 = vmatprep.subr.mxu1 %v781_v0  ;;  %590 = vmatpush3.msra.mxu0 %v82_v2  ;;  %v79_v8 = vld [vmem:[#allocation7] sm:$0xff]  ;;  %v77_v10 = vld [vmem:[#allocation2] sm:$0xff]  ;;  %v78_v11 = vld [vmem:[#allocation2 + $0x8] sm:$0xff]  ;;  %vm307_vm2 = vcmask 1041409   ;;  %vm310_vm3 = vcmask 58368   ;;  %v784_v46 = vmov 0  }
  0x36   :  { %603 = vmatpush3.msra.mxu1 %v168_v3  ;;  %591 = vmatprep.subr.mxu0 %v81_v4  ;;  %v246_v15 = vunpack.c.0.s8 %v245_v13  ;;  %v844_v20 = vsub.s32 0, %v840_v16  ;;  %v571_v31 = vld [vmem:[%s874_s4] ss:$0 sm:$0xff]  ;;  %v301_v40 = vsub.s32 %v298_v38, %v840_v16  ;;  %v321_v47 = vsub.s32 1, %v840_v16  ;;  %s785_s4 = smov [#allocation11]  }
  0x37   :  { %604 = vmatprep.subr.mxu1 %v781_v0  ;;  %592 = vmatpush3.msra.mxu0 %v81_v4  ;;  %vm374_vm4 = vcmask 64512   ;;  %s553_s17 = sshll.u32 %s785_s4, 4  ;;  %s554_s17 = int_to_ptr.vmem [resolvable:$true] %s553_s17 }
  0x38   :  { %605 = vmatpush3.msra.mxu1 %v167_v5  ;;  %593 = vmatprep.subr.mxu0 %v80_v6  ;;  %v249_v17 = vsub.s32 %v246_v15, %v840_v16  ;;  %s725_s18 = scalar_lea.vmem %s554_s17, 32  ;;  %p730_p7 = scmp.lt.s32.totalorder %s554_s17, %s554_s17 }
  0x39   :  { %606 = vmatprep.subr.mxu1 %v781_v0  ;;  %594 = vmatpush3.msra.mxu0 %v80_v6  ;;  %p726_p6 = scmp.ne.s32.totalorder %s554_s17, %s725_s18  ;;  %p731_p8 = scmp.lt.s32.totalorder %s725_s18, %s725_s18 }
  0x3a   :  { %607 = vmatpush3.msra.mxu1 %v166_v7  ;;  %595 = vmatprep.subr.mxu0 %v79_v8 }
  0x3b   :  { %609 = vmatmul.mubr.msk.f32.vlgmr.msra.gmra.mxu1 %vm83_vm1, %v165_v9  ;;  %596 = vmatpush3.msra.mxu0 %v79_v8  ;;  %p732_p9 = por %p731_p8, %p730_p7 }
  0x3c   :  { %597 = vmatprep.mubr.msk.f32.mxu0 %vm83_vm1, %v77_v10  ;;  %616 = vmatprep.subr.mxu1 %v781_v0 }
  0x3d   :  { %598 = vmatmul.mubr.msk.f32.vlgmr.msra.gmra.mxu0 %vm83_vm1, %v78_v11  ;;  %617 = vmatpush3.msra.mxu1 %v78_v11  ;;  %p733_p10 = pnand %p732_p9, %p726_p6 }
  0x3e   :  { %611 = vmatprep.subr.mxu0 %v781_v0  ;;  %618 = vmatprep.mubr.msk.f32.mxu1 %vm782_vm0, %v781_v0 }
  0x3f   :  { %612 = vmatpush3.msra.mxu0 %v77_v10  ;;  %613 = vmatprep.mubr.msk.f32.mxu0 %vm782_vm0, %v781_v0 }
  0x40   :  { %634 = vset.pattern.permute.xlu0 %v784_v46  ;;  %633 = vset.pattern.permute.xlu1 %v784_v46 }
  0xfb   :  { %v239_v18 = vpop.f32.mrf.mxu1 }
  0xfc   :  { %v250_v19 = vrot.slane %v239_v18, %v249_v17 }
  0xfd   :  { %v599_v21 = vpop.f32.mrf.mxu0  ;;  %v610_v22 = vpop.f32.mrf.mxu1 }
  0xfe   :  { %v251_v23 = vcombine.high %v250_v19, %v250_v19  ;;  %v258_v24 = vrot.slane %v250_v19, %v249_v17 }
  0xff   :  { %v156_v27 = vpop.f32.mrf.mxu0 }
 0x100   :  { %v265_v25 = vrot.slane %v251_v23, %v249_v17  ;;  %v269_v26 = vrot.slane %v258_v24, %v844_v20 }
 0x102   :  { %v273_v28 = vrot.slane %v265_v25, %v844_v20  ;;  %v276_v29 = vadd.f32 %v269_v26, %v156_v27 }
 0x104   :  { %v277_v30 = vadd.f32 %v599_v21, %v273_v28  ;;  %635 = vtanh.f32 %v276_v29 }
 0x106   :  { %637 = vtanh.f32 %v277_v30 }
 0x111   :  { %v636_v32 = vpop.eup %635 }
 0x112   :  { %v287_v33 = vmul.f32 %v636_v32, %v571_v31 }
 0x113   :  { %v638_v34 = vpop.eup %637 }
 0x114   :  { %v289_v35 = vsel %vm83_vm1, %v287_v33, 0.0  ;;  %v288_v36 = vmul.f32 %v638_v34, %v571_v31 }
 0x115   :  { %290 = vadd.xlane.f32.xlu0 %v289_v35 }
 0x116   :  { %v292_v37 = vsel %vm83_vm1, %v288_v36, 0.0 }
 0x119   :  { %293 = vadd.xlane.f32.xlu0 %v292_v37 }
 0x19e   :  { %v291_v39 = vpop.xlane.xlu0 %290 }
 0x19f   :  { %v302_v42 = vrot.slane %v291_v39, %v301_v40 }
 0x1a2   :  { %v294_v41 = vpop.xlane.xlu0 %293 }
 0x1a3   :  { %v306_v43 = vrot.slane %v294_v41, %v301_v40 }
 0x1a5   :  { %v308_v44 = vsel %vm307_vm2, %v306_v43, %v302_v42 }
 0x1a6   :  { %v311_v45 = vsel %vm310_vm3, %v308_v44, -inf }
 0x1a7   :  { %312 = vmax.xlane.f32.xlu1 %v311_v45 }
 0x230   :  { %v313_v48 = vpop.xlane.xlu1 %312 }
 0x231   :  { %v318_v49 = vrot.slane %v313_v48, %v844_v20  ;;  %v322_v50 = vrot.slane %v313_v48, %v321_v47 }
 0x233   :  { %v325_v51 = vsub.f32 %v291_v39, %v318_v49  ;;  %v326_v52 = vsub.f32 %v294_v41, %v322_v50 }
 0x235   :  { %v327_v53 = vmul.f32 1.442695, %v325_v51  ;;  %v329_v54 = vmul.f32 1.442695, %v326_v52 }
 0x237   :  { %639 = vpow2.f32 %v327_v53 }
 0x238   :  { %641 = vpow2.f32 %v329_v54 }
 0x244   :  { %v640_v55 = vpop.eup %639 }
 0x245   :  { %v642_v56 = vpop.eup %641  ;;  %334 = vperm.xlu1 %633, %v640_v55  }
 0x246   :  { %337 = vperm.xlu0 %634, %v642_v56  }
 0x2c0   :  { %v335_v57 = vpop.permute.xlu1 %334 }
 0x2c1   :  { %v338_v58 = vpop.permute.xlu0 %337  ;;  %v342_v59 = vrot.slane %v335_v57, %v301_v40 }
 0x2c2   :  { %v346_v60 = vrot.slane %v338_v58, %v301_v40 }
 0x2c4   :  { %v347_v61 = vsel %vm307_vm2, %v346_v60, %v342_v59 }
 0x2c5   :  { %v349_v62 = vsel %vm310_vm3, %v347_v61, 0.0 }
 0x2c6   :  { %350 = vadd.xlane.f32.xlu1 %v349_v62 }
 0x34f   :  { %v351_v63 = vpop.xlane.xlu1 %350 }
 0x350   :  { %643 = vrcp.f32 %v351_v63 }
 0x35d   :  { %v644_v0 = vpop.eup %643 }
 0x35e   :  { %v361_v1 = vrot.slane %v644_v0, %v321_v47  ;;  %v357_v3 = vrot.slane %v644_v0, %v844_v20 }
 0x360   :  { %v365_v2 = vmul.f32 %v642_v56, %v361_v1  ;;  %v364_v4 = vmul.f32 %v640_v55, %v357_v3 }
 0x362   :  { %449 = vperm.xlu0 %634, %v365_v2  }
 0x366   :  { %368 = vperm.xlu0 %634, %v364_v4  }
 0x3dd   :  { %v450_v5 = vpop.permute.xlu0 %449 }
 0x3de   :  { %v454_v6 = vrot.slane %v450_v5, %v301_v40 }
 0x3e0   :  { %619 = vmatmul.mubr.msk.f32.vlgmr.msra.gmra.mxu1 %vm374_vm4, %v454_v6 }
 0x3e1   :  { %v369_v7 = vpop.permute.xlu0 %368 }
 0x3e2   :  { %v373_v8 = vrot.slane %v369_v7, %v301_v40 }
 0x3e4   :  { %614 = vmatmul.mubr.msk.f32.vlgmr.msra.gmra.mxu0 %vm374_vm4, %v373_v8  ;;  %v534_v9 = vsel %vm307_vm2, %v454_v6, %v373_v8 }
 0x3e5   :  { %536 = vst.msk [vmem:[#allocation11] sm:$0x3] %vm310_vm3, %v534_v9 }
 0x3e6   :  { %736 = shalt.err (!%p733_p10)
}
 0x3e7   :  { %556 = dma.vmem_to_hbm [thread:$0]  %s554_s17, 32, %s876_s6, [#allocation12]   ;;  %vm532_vm5 = vcmask 254976  }
 0x3e8   :  { %s786_s21 = smov [#allocation10]  }
 0x3e9   :  { %s543_s22 = sshll.u32 %s786_s21, 4  ;;  %s544_s22 = int_to_ptr.vmem [resolvable:$true] %s543_s22 }
 0x3ea   :  { %s745_s23 = scalar_lea.vmem %s544_s22, 32  ;;  %p750_p12 = scmp.lt.s32.totalorder %s544_s22, %s544_s22 }
 0x3eb   :  { %p746_p11 = scmp.ne.s32.totalorder %s544_s22, %s745_s23  ;;  %p751_p13 = scmp.lt.s32.totalorder %s745_s23, %s745_s23 }
 0x3ed   :  { %p752_p0 = por %p751_p13, %p750_p12 }
 0x3ef   :  { %p753_p1 = pnand %p752_p0, %p746_p11 }
 0x4a0   :  { %v523_v10 = vpop.f32.mrf.mxu1 }
 0x4a1   :  { %v529_v12 = vrot.slane %v523_v10, 7 }
 0x4a2   :  { %v620_v11 = vpop.f32.mrf.mxu1 }
 0x4a4   :  { %v443_v13 = vpop.f32.mrf.mxu0 }
 0x4a5   :  { %v530_v14 = vsel %vm307_vm2, %v529_v12, %v443_v13 }
 0x4a6   :  { %v615_v15 = vpop.f32.mrf.mxu0  ;;  %533 = vst.msk [vmem:[#allocation10] sm:$0x3] %vm532_vm5, %v530_v14 }
 0x4a7   :  { %756 = shalt.err (!%p753_p1)
}
 0x4a8   :  { %546 = dma.vmem_to_hbm [thread:$0]  %s544_s22, 32, %s875_s5, [#allocation4]  }
 0x4a9   :  { %771 = dma.done.wait [#allocation4], 32  }
 0x4aa   :  { %772 = vsyncadd [#allocation4], 4294967264 }
 0x4ab   :  { %773 = dma.done.wait [#allocation12], 32  }
 0x4ac   :  { %774 = vsyncadd [#allocation12], 4294967264 }
 0x4ad   :  { %563 = vsyncpa [#allocation3], 1 }
 0x4ae   :  { %564 = vsyncpa [#allocation6], 1 }
 0x4af   :  { %565 = vsyncpa [#allocation9], 1 }
 0x4b0   :  { %566 = vsyncpa [#allocation4], 1 }
 0x4b1   :  { %567 = vsyncpa [#allocation12], 1 }

</bundles_post_ra>
